<compile_context>
chip_gen: v7x
topology: tpu7x:2x2x1
jax: 0.10.0
libtpu: 0.0.40
codegen_flags: <defaults>
</compile_context>

<pallas_src>
import functools

import jax
import jax.numpy as jnp
from jax.experimental import pallas as pl
from jax.experimental.pallas import tpu as pltpu


# ----------------------------- Pallas kernel --------------------------------

def _relu_kernel(x_ref, o_ref):
    # Elementwise ReLU on the whole VMEM tile (VPU op; kernel is DMA/HBM-bound).
    o_ref[...] = jnp.maximum(x_ref[...], 0)


_LANE = 128
_MAX_SINGLE_BLOCK_BYTES = 16 * 1024 * 1024  # guard for pathological unaligned shapes


def _sublane_for_dtype(dtype) -> int:
    # f32 -> 8, bf16/f16 -> 16, int8/fp8 -> 32 (sub-32-bit dtypes pack along sublanes).
    itemsize = jnp.dtype(dtype).itemsize
    return max(8, 32 // itemsize)


def _default_block_bytes() -> int:
    """Per-generation streaming block size (bytes per buffer).

    v7x : 8 MiB  (at ~3.2 TB/s a 2 MiB block makes the ~0.35 us per-step overhead a
                  ~25% tax; 4 buffers = 32 MiB, covered via vmem_limit_bytes, well
                  inside the 64 MiB physical VMEM per TensorCore).
    v6e : 4 MiB  (16 MiB of double buffers, inside the 32 MiB default scoped VMEM).
    v5e / unknown: 2 MiB (8 MiB of buffers, inside v5e's 16 MiB scoped VMEM;
                  bigger blocks buy ~nothing at ~820 GB/s).
    """
    try:
        kind = jax.devices()[0].device_kind.lower()
    except Exception:
        return 2 << 20
    if "v7" in kind or "7x" in kind:
        return 8 << 20
    if "v6" in kind:
        return 4 << 20
    return 2 << 20


def _relu_2d(x2d: jax.Array, rows: int, cols: int, block_bytes: int,
             donate_input: bool) -> jax.Array:
    dtype = x2d.dtype
    itemsize = jnp.dtype(dtype).itemsize
    sublane = _sublane_for_dtype(dtype)

    row_bytes = cols * itemsize
    target_rows = max(sublane, (block_bytes // row_bytes) // sublane * sublane)
    if rows > target_rows:
        block_rows = target_rows  # ragged last block handled by masked writeback
    else:
        block_rows = rows         # single block == full array dims (always legal)

    block_bytes_actual = block_rows * row_bytes
    grid = (pl.cdiv(rows, block_rows),)

    extra = {}
    if donate_input:
        # Only profitable when the caller can actually donate x (e.g. a dead temporary
        # inside a larger jit); otherwise XLA inserts a defensive copy (an extra pass).
        extra["input_output_aliases"] = {0: 0}

    return pl.pallas_call(
        _relu_kernel,
        out_shape=jax.ShapeDtypeStruct((rows, cols), dtype),
        grid=grid,
        in_specs=[pl.BlockSpec((block_rows, cols), lambda i: (i, 0))],
        out_specs=pl.BlockSpec((block_rows, cols), lambda i: (i, 0)),
        compiler_params=pltpu.CompilerParams(
            # "parallel" lets v7x shard the 1-D grid across both TensorCores.
            dimension_semantics=("parallel",),
            # 2x input + 2x output double buffers, plus headroom for Mosaic scratch.
            vmem_limit_bytes=4 * block_bytes_actual + (8 << 20),
        ),
        cost_estimate=pl.CostEstimate(
            flops=rows * cols,
            transcendentals=0,
            bytes_accessed=2 * rows * cols * itemsize,
        ),
        **extra,
    )(x2d)


@functools.partial(jax.jit, static_argnames=("block_bytes", "donate_input"))
def pallas_relu(x: jax.Array, *, block_bytes: int | None = None,
                donate_input: bool = False) -> jax.Array:
    """ReLU as a Pallas TPU kernel: single-pass HBM streaming, no pad/slice passes."""
    orig_shape = x.shape
    n = x.size
    if n == 0:
        return x

    if block_bytes is None:
        block_bytes = _default_block_bytes()

    if n % _LANE == 0:
        # Lane-dense view: (rows, 128). Layout-preserving reshape of the flat buffer.
        rows, cols = n // _LANE, _LANE
    elif x.ndim >= 2:
        # Ragged total size: keep the natural (prod(leading), last_dim) 2-D view so no
        # jnp.pad / slice HBM round trips are needed; the cdiv grid masks the ragged
        # last row-block inside the kernel (OOB stores are dropped — safe for ReLU).
        cols = orig_shape[-1]
        rows = n // cols
    else:
        # 0-/1-D, not lane aligned: one full-shape block.
        rows, cols = 1, n

    itemsize = jnp.dtype(x.dtype).itemsize
    sublane = _sublane_for_dtype(x.dtype)
    if min(rows, sublane) * cols * itemsize > _MAX_SINGLE_BLOCK_BYTES:
        # TODO(synk): pathological unaligned shape (huge unaligned trailing dim); let
        # XLA handle it rather than padding (padding would add 2 extra HBM passes).
        return jnp.maximum(x, 0)

    out2d = _relu_2d(jnp.reshape(x, (rows, cols)), rows, cols, block_bytes, donate_input)
    return jnp.reshape(out2d, orig_shape)


# ----------------------------- MyArch equivalent ----------------------------

class MyArchPallas:
    """JAX/Pallas equivalent of the torch MyArch stub.

    The torch module has no parameters; when args.act == 'relu' it owns a ReLU
    activation (the only defined compute), exposed here as `self.act`.
    """

    def __init__(self, act: str = "relu"):
        if act == "relu":
            self.act = pallas_relu
        else:
            self.act = None

    def forward(self, input, label, metric_log=False):
        # Reference forward() body is `pass` -> returns None. Reproduced exactly.
        # TODO(synk): reference forward has no compute to translate.
        return None

    def __call__(self, input, label, metric_log=False):
        return self.forward(input, label, metric_log)

    def inference(self, input):
        # Reference inference() body is `pass` -> returns None. Reproduced exactly.
        # TODO(synk): reference inference has no compute to translate.
        return None

    def apply_act(self, x):
        """Runs the only real compute the module defines (self.act = ReLU)."""
        assert self.act is not None
        return self.act(x)


# ----------------------------------- main ------------------------------------

if __name__ == "__main__":
    key = jax.random.PRNGKey(0)
    # Small NCHW input consistent with a conv-style architecture: [2, 4, 16, 16].
    x = jax.random.normal(key, (2, 4, 16, 16), dtype=jnp.float32)

    model = MyArchPallas(act="relu")

    # forward()/inference() are stubs in the reference -> return None.
    fwd_out = model([x], [jnp.zeros((2,), jnp.int32)], metric_log=False)
    inf_out = model.inference([x])
    assert fwd_out is None and inf_out is None

    # 1) Lane-aligned f32 NCHW tensor (primary (rows, 128) streaming path).
    y = jax.block_until_ready(model.apply_act(x))
    y_ref = jnp.maximum(x, 0.0)
    assert y.shape == x.shape and y.dtype == x.dtype
    assert bool(jnp.allclose(y, y_ref)), "Pallas ReLU mismatch vs reference (f32)"

    # 2) bf16 path (16-row sublane packing).
    x_bf16 = x.astype(jnp.bfloat16)
    y_bf16 = jax.block_until_ready(model.apply_act(x_bf16))
    assert y_bf16.dtype == jnp.bfloat16
    assert bool(jnp.all(y_bf16 == jnp.maximum(x_bf16, 0))), "Pallas ReLU mismatch (bf16)"

    # 3) Non-lane-aligned shape: no pad/slice passes, natural (rows, last_dim) view.
    x_odd = jax.random.normal(jax.random.PRNGKey(1), (3, 5, 7), dtype=jnp.float32)
    y_odd = jax.block_until_ready(model.apply_act(x_odd))
    assert y_odd.shape == x_odd.shape
    assert bool(jnp.allclose(y_odd, jnp.maximum(x_odd, 0.0))), "Pallas ReLU mismatch (odd)"

    # 4) Ragged multi-block grid (masked last-block writeback), forced with a tiny
    #    block size so the test stays small: 20 rows with 8-row blocks -> grid of 3.
    x_rag = jax.random.normal(jax.random.PRNGKey(2), (20, 128), dtype=jnp.float32)
    y_rag = jax.block_until_ready(pallas_relu(x_rag, block_bytes=8 * 128 * 4))
    assert bool(jnp.allclose(y_rag, jnp.maximum(x_rag, 0.0))), "Pallas ReLU mismatch (ragged)"

    print("KERNEL_OK")
</pallas_src>

<mosaic_0001>
module attributes {stable_mosaic.version = 11 : i64} {
  func.func @_relu_kernel(%arg0: i32, %arg1: memref<16x128xf32, #tpu.memory_space<vmem>>, %arg2: memref<16x128xf32, #tpu.memory_space<vmem>>) attributes {dimension_semantics = [#tpu.dimension_semantics<parallel>], iteration_bounds = array<i64: 1>, scalar_prefetch = 0 : i64, scratch_operands = 0 : i64, tpu.core_type = #tpu.core_type<tc>, window_params = [{transform_indices = @transform_0, window_bounds = array<i64: 16, 128>}, {transform_indices = @transform_1, window_bounds = array<i64: 16, 128>}]} {
    %c0 = arith.constant 0 : index
    %c0_0 = arith.constant 0 : index
    %0 = vector.load %arg1[%c0, %c0_0] : memref<16x128xf32, #tpu.memory_space<vmem>>, vector<16x128xf32>
    %cst = arith.constant 0.000000e+00 : f32
    %1 = vector.broadcast %cst : f32 to vector<16x128xf32>
    %2 = arith.maximumf %0, %1 : vector<16x128xf32>
    %c0_1 = arith.constant 0 : index
    %c0_2 = arith.constant 0 : index
    %3 = vector.load %arg2[%c0_1, %c0_2] : memref<16x128xf32, #tpu.memory_space<vmem>>, vector<16x128xf32>
    tpu.vector_store %arg2[%c0_1, %c0_2], %2 {strides = array<i32>} : memref<16x128xf32, #tpu.memory_space<vmem>>, vector<16x128xf32>,
    return
  }
  func.func @transform_0(%arg0: i32) -> (i32, i32) {
    %c0_i32 = arith.constant 0 : i32
    %c0_i32_0 = arith.constant 0 : i32
    return %arg0, %c0_i32 : i32, i32
  }
  func.func @transform_1(%arg0: i32) -> (i32, i32) {
    %c0_i32 = arith.constant 0 : i32
    %c0_i32_0 = arith.constant 0 : i32
    return %arg0, %c0_i32 : i32, i32
  }
}

</mosaic_0001>

<bundles_post_ra>
// kernel: pallas_relu.1
= control target key start
LH: loop header
LB: loop body
LE: loop exit
PB: predicated region body
PF: predicated region fallthrough
CT: control target
= control target key end

     0   :  { %s40_s0 = inlined_call_operand.vmem [shape: f32[16,128], index: 0, kind: input, shape index: {}]   ;;  %s41_s1 = inlined_call_operand.vmem [shape: f32[16,128], index: 1, kind: output, shape index: {}]  }
   0x1   :  { %v8_v0 = vld [vmem:[%s40_s0] sm:$0xff]  ;;  %v9_v1 = vld [vmem:[%s40_s0 + $0x8] sm:$0xff] }
   0x2   :  { %v10_v2 = vmax.f32 %v8_v0, 0.0  ;;  %v11_v3 = vmax.f32 %v9_v1, 0.0 }
   0x4   :  { %12 = vst [vmem:[%s41_s1] sm:$0xff] %v10_v2  ;;  %13 = vst [vmem:[%s41_s1 + $0x8] sm:$0xff] %v11_v3 }

</bundles_post_ra>
